<compile_context>
chip_gen: v6e
topology: v6e:2x2x1
jax: 0.10.0
libtpu: 0.0.40
codegen_flags: <defaults>
</compile_context>

<pallas_src>
import functools

import jax
import jax.numpy as jnp
from jax.experimental import pallas as pl
from jax.experimental.pallas import tpu as pltpu

LANE = 128   # lane width (minor dim)
SUB = 8      # f32 sublane width (second-to-last dim)


def _round_up(x, m):
    return ((x + m - 1) // m) * m


def decoder_kernel(h_ref, p_ref, out_ref, *, H, off_w1b, off_b1, off_w2,
                   off_b2):
    """One batch tile: layer-mean -> Linear(2H,16) -> ReLU -> Linear(16,7).

    h_ref  : (L, 2, bt, H)  all layers, both directions, one batch tile
    p_ref  : (R, 128)       packed params (fetched once):
               rows [0, H)                 : W1_fwd / L
               rows [off_w1b, off_w1b + H) : W1_bwd / L
               row  off_b1                 : b1
               rows [off_w2, off_w2 + 128) : W2 zero-padded to (128, 128)
               row  off_b2                 : b2
             (all offsets are multiples of 8 sublanes; unused lanes/rows = 0)
    out_ref: (bt, 8)        output tile (lanes >= Do are zero)
    """
    # Mean over layers with 1/L folded into W1: sum_l h_l is a pure VPU
    # reduction over the leading (untiled) block axis -- no XLU, and no
    # per-layer accumulator RMW in VMEM.
    h_sum = jnp.sum(h_ref[...].astype(jnp.float32), axis=0)      # (2, bt, H)

    # One dot per direction -- the only MXU pushes for the whole tile.  Fusing
    # them into a single (direction, H) contraction would need either a
    # multi-contracting-dim dot_general or a sublane transpose of h; with the
    # layer axis already collapsed the gain is negligible, so keep it robust.
    w1_fwd = p_ref[0:H, :]                                        # (H, 128)
    w1_bwd = p_ref[off_w1b:off_w1b + H, :]                        # (H, 128)
    acc = jnp.dot(h_sum[0], w1_fwd, preferred_element_type=jnp.float32)
    acc = acc + jnp.dot(h_sum[1], w1_bwd, preferred_element_type=jnp.float32)

    b1 = p_ref[off_b1:off_b1 + 1, :]                              # (1, 128)
    w2 = p_ref[off_w2:off_w2 + LANE, :]                           # (128, 128)
    b2 = p_ref[off_b2:off_b2 + 1, :]                              # (1, 128)
    z = jnp.maximum(acc + b1, 0.0)                                # ReLU (VPU)
    y = jnp.dot(z, w2, preferred_element_type=jnp.float32) + b2   # (bt, 128)
    out_ref[...] = y[:, :out_ref.shape[-1]].astype(out_ref.dtype)


def pack_decoder_params(w1, b1, w2, b2, num_layers):
    """Pack the MLP params into one lane-dense (R, 128) f32 slab.

    w1: (2H, Dh), b1: (Dh,), w2: (Dh, Do), b2: (Do,), with Dh, Do <= 128.
    The mean over `num_layers` layers is folded into W1 (rows pre-scaled by
    1/L).  Section offsets are multiples of 8 sublanes so in-kernel slices
    never straddle a sublane tile (valid for any H).
    """
    D, Dh = w1.shape
    Do = w2.shape[1]
    assert D % 2 == 0 and Dh <= LANE and Do <= LANE and w2.shape[0] == Dh
    H = D // 2
    hp = _round_up(H, SUB)
    off_w1b = hp
    off_b1 = 2 * hp
    off_w2 = off_b1 + SUB
    off_b2 = off_w2 + LANE
    R = off_b2 + SUB

    inv_l = 1.0 / float(num_layers)
    slab = jnp.zeros((R, LANE), jnp.float32)
    slab = slab.at[0:H, 0:Dh].set(w1[:H].astype(jnp.float32) * inv_l)
    slab = slab.at[off_w1b:off_w1b + H, 0:Dh].set(
        w1[H:].astype(jnp.float32) * inv_l)
    slab = slab.at[off_b1, 0:Dh].set(b1.astype(jnp.float32))
    slab = slab.at[off_w2:off_w2 + Dh, 0:Do].set(w2.astype(jnp.float32))
    slab = slab.at[off_b2, 0:Do].set(b2.astype(jnp.float32))
    layout = dict(H=H, off_w1b=off_w1b, off_b1=off_b1, off_w2=off_w2,
                  off_b2=off_b2, R=R, out_dim=Do)
    return slab, layout


def _pick_batch_tile(B, L, H, itemsize):
    """Rows of h per grid step.

    Big enough that each step streams >= ~1 MiB of h (so the ~0.35us per-step
    cost is well amortized on v5e..v7x), small enough that the double-buffered
    128-lane-padded h block stays under ~16 MiB of VMEM, and >= 2 tiles on the
    leading "parallel" axis whenever B >= 16 so both v7x TensorCores get work
    (no effect on 1-TC v5e/v6e).
    """
    if B <= SUB:
        return B
    bt_mega = _round_up(pl.cdiv(B, 2), SUB) if B >= 16 else _round_up(B, SUB)
    bt_bw = _round_up(pl.cdiv(1 << 20, max(1, 2 * L * H * itemsize)), SUB)
    bt_vmem = max(SUB, ((16 << 20) // (2 * 2 * L * _round_up(H, LANE) * 4))
                  // SUB * SUB)
    bt = max(SUB, min(bt_mega, bt_bw, bt_vmem))
    return min(bt, _round_up(B, SUB))


def _decoder_pallas_call(h4, slab, layout):
    """h4: (L, 2, B, H) f32/bf16, slab: (R, 128) f32 -> (B, out_dim) f32."""
    L, _, B, H = h4.shape
    R = layout["R"]
    out_pad = SUB                            # Do=7 padded to 8 output lanes
    bt = _pick_batch_tile(B, L, H, h4.dtype.itemsize)
    grid = (pl.cdiv(B, bt),)

    # Explicit VMEM budget: double-buffered h block (lane-padded to 128) +
    # slab + out, with margin; >= scoped default on all gens, <= v7x physical.
    bt_pad = _round_up(bt, SUB)
    est = (2 * L * 2 * bt_pad * _round_up(H, LANE) * h4.dtype.itemsize
           + 2 * R * LANE * 4 + 2 * bt_pad * LANE * 4)
    vmem_limit = int(min(max(2 * est, 32 << 20), 48 << 20))

    kernel = functools.partial(
        decoder_kernel, H=H, off_w1b=layout["off_w1b"],
        off_b1=layout["off_b1"], off_w2=layout["off_w2"],
        off_b2=layout["off_b2"])

    out = pl.pallas_call(
        kernel,
        out_shape=jax.ShapeDtypeStruct((B, out_pad), jnp.float32),
        grid_spec=pltpu.PrefetchScalarGridSpec(
            num_scalar_prefetch=0,
            grid=grid,
            in_specs=[
                # whole layer stack + both directions for one batch tile
                pl.BlockSpec((L, 2, bt, H), lambda b: (0, 0, b, 0)),
                # resident param slab (constant index_map => fetched once)
                pl.BlockSpec((R, LANE), lambda b: (0, 0)),
            ],
            out_specs=pl.BlockSpec((bt, out_pad), lambda b: (b, 0)),
        ),
        compiler_params=pltpu.CompilerParams(
            dimension_semantics=("parallel",),
            vmem_limit_bytes=vmem_limit),
    )(h4, slab)
    return out[:, :layout["out_dim"]]


def make_decoder(w1, b1, w2, b2, num_layers):
    """Pack params ONCE and return a jitted `h -> (B, out_dim)` forward.

    The packed slab becomes a jit-time constant of the returned closure, so no
    per-call host-side packing work remains.
    """
    slab, layout = pack_decoder_params(w1, b1, w2, b2, num_layers)

    @jax.jit
    def forward(h):
        two_l, B, H = h.shape
        assert two_l == 2 * num_layers
        # Free contiguous reshape: h[2l] -> h4[l,0] (fwd), h[2l+1] -> h4[l,1].
        h4 = h.reshape(num_layers, 2, B, H)
        return _decoder_pallas_call(h4, slab, layout)

    return forward


def decoder_forward(h, w1, b1, w2, b2):
    """Convenience one-shot wrapper (re-packs params on every call)."""
    return make_decoder(w1, b1, w2, b2, h.shape[0] // 2)(h)


def decoder_reference(h, w1, b1, w2, b2):
    """Pure-JAX mirror of the PyTorch forward (correctness check)."""
    h_for = h[::2]
    h_back = h[1::2]
    context = jnp.concatenate([h_for, h_back], axis=-1)         # (L, B, 2H)
    context = jnp.transpose(context, (1, 0, 2)).mean(axis=1)    # (B, 2H)
    z = jnp.maximum(context @ w1 + b1, 0.0)
    return z @ w2 + b2


if __name__ == "__main__":
    # L=2 bidirectional layers, batch=2, hidden=8 => concat size 2H = 16
    # => Decoder(input_size=16); MLP 16 -> 16 -> 7.
    L, B, H = 2, 2, 8
    input_size = 2 * H          # 16
    hidden = 16
    out_dim = 7

    key = jax.random.PRNGKey(0)
    k_h, k_w1, k_b1, k_w2, k_b2 = jax.random.split(key, 5)

    h = jax.random.normal(k_h, (2 * L, B, H), dtype=jnp.float32)
    # PyTorch Linear stores (out, in); we keep the (in, out) transpose, x @ W.
    w1 = jax.random.normal(k_w1, (input_size, hidden), dtype=jnp.float32) * 0.1
    b1 = jax.random.normal(k_b1, (hidden,), dtype=jnp.float32) * 0.1
    w2 = jax.random.normal(k_w2, (hidden, out_dim), dtype=jnp.float32) * 0.1
    b2 = jax.random.normal(k_b2, (out_dim,), dtype=jnp.float32) * 0.1

    decoder = make_decoder(w1, b1, w2, b2, num_layers=L)   # packs slab once
    out = jax.block_until_ready(decoder(h))
    ref = decoder_reference(h, w1, b1, w2, b2)

    assert out.shape == (B, out_dim), out.shape
    assert jnp.allclose(out, ref, atol=1e-5, rtol=1e-5), (out, ref)

    print("KERNEL_OK")
</pallas_src>

<mosaic_0001>
module attributes {stable_mosaic.version = 11 : i64} {
  func.func @decoder_kernel(%arg0: i32, %arg1: memref<2x2x2x8xf32, #tpu.memory_space<vmem>>, %arg2: memref<160x128xf32, #tpu.memory_space<vmem>>, %arg3: memref<2x8xf32, #tpu.memory_space<vmem>>) attributes {dimension_semantics = [#tpu.dimension_semantics<parallel>], iteration_bounds = array<i64: 1>, scalar_prefetch = 0 : i64, scratch_operands = 0 : i64, tpu.core_type = #tpu.core_type<tc>, window_params = [{transform_indices = @transform_0, window_bounds = array<i64: 2, 2, 2, 8>}, {pipeline_mode = #tpu.pipeline_mode<synchronous>, transform_indices = @transform_1, window_bounds = array<i64: 160, 128>}, {transform_indices = @transform_2, window_bounds = array<i64: 2, 8>}]} {
    %c0 = arith.constant 0 : index
    %c0_0 = arith.constant 0 : index
    %c0_1 = arith.constant 0 : index
    %c0_2 = arith.constant 0 : index
    %0 = vector.load %arg1[%c0, %c0_0, %c0_1, %c0_2] : memref<2x2x2x8xf32, #tpu.memory_space<vmem>>, vector<2x2x2x8xf32>
    %cst = arith.constant dense<0.000000e+00> : vector<2x2x8xf32>
    %1 = vector.multi_reduction <add>, %0, %cst [0] : vector<2x2x2x8xf32> to vector<2x2x8xf32>
    %c0_3 = arith.constant 0 : index
    %c0_4 = arith.constant 0 : index
    %2 = vector.load %arg2[%c0_3, %c0_4] : memref<160x128xf32, #tpu.memory_space<vmem>>, vector<8x128xf32>
    %c8 = arith.constant 8 : index
    %c0_5 = arith.constant 0 : index
    %3 = vector.load %arg2[%c8, %c0_5] : memref<160x128xf32, #tpu.memory_space<vmem>>, vector<8x128xf32>
    %4 = vector.extract_strided_slice %1 {offsets = [0, 0, 0], sizes = [1, 2, 8], strides = [1, 1, 1]} : vector<2x2x8xf32> to vector<1x2x8xf32>
    %5 = vector.shape_cast %4 : vector<1x2x8xf32> to vector<2x8xf32>
    %cst_6 = arith.constant dense<0.000000e+00> : vector<2x128xf32>
    %6 = tpu.matmul %5, %2, %cst_6 {dimension_numbers = #tpu.dot_dimension_numbers<[1], [0], [0], [1], [0, 0, 1, 1], [], []>} : vector<2x8xf32>, vector<8x128xf32>, vector<2x128xf32> -> vector<2x128xf32>
    %7 = vector.extract_strided_slice %1 {offsets = [1, 0, 0], sizes = [1, 2, 8], strides = [1, 1, 1]} : vector<2x2x8xf32> to vector<1x2x8xf32>
    %8 = vector.shape_cast %7 : vector<1x2x8xf32> to vector<2x8xf32>
    %cst_7 = arith.constant dense<0.000000e+00> : vector<2x128xf32>
    %9 = tpu.matmul %8, %3, %cst_7 {dimension_numbers = #tpu.dot_dimension_numbers<[1], [0], [0], [1], [0, 0, 1, 1], [], []>} : vector<2x8xf32>, vector<8x128xf32>, vector<2x128xf32> -> vector<2x128xf32>
    %10 = arith.addf %6, %9 : vector<2x128xf32>
    %c16 = arith.constant 16 : index
    %c0_8 = arith.constant 0 : index
    %11 = vector.load %arg2[%c16, %c0_8] : memref<160x128xf32, #tpu.memory_space<vmem>>, vector<1x128xf32>
    %c24 = arith.constant 24 : index
    %c0_9 = arith.constant 0 : index
    %12 = vector.load %arg2[%c24, %c0_9] : memref<160x128xf32, #tpu.memory_space<vmem>>, vector<128x128xf32>
    %c152 = arith.constant 152 : index
    %c0_10 = arith.constant 0 : index
    %13 = vector.load %arg2[%c152, %c0_10] : memref<160x128xf32, #tpu.memory_space<vmem>>, vector<1x128xf32>
    %14 = vector.broadcast %11 : vector<1x128xf32> to vector<2x128xf32>
    %15 = arith.addf %10, %14 : vector<2x128xf32>
    %cst_11 = arith.constant 0.000000e+00 : f32
    %16 = vector.broadcast %cst_11 : f32 to vector<2x128xf32>
    %17 = arith.maximumf %15, %16 : vector<2x128xf32>
    %cst_12 = arith.constant dense<0.000000e+00> : vector<2x128xf32>
    %18 = tpu.matmul %17, %12, %cst_12 {dimension_numbers = #tpu.dot_dimension_numbers<[1], [0], [0], [1], [0, 0, 1, 1], [], []>} : vector<2x128xf32>, vector<128x128xf32>, vector<2x128xf32> -> vector<2x128xf32>
    %19 = vector.broadcast %13 : vector<1x128xf32> to vector<2x128xf32>
    %20 = arith.addf %18, %19 : vector<2x128xf32>
    %21 = vector.extract_strided_slice %20 {offsets = [0, 0], sizes = [2, 8], strides = [1, 1]} : vector<2x128xf32> to vector<2x8xf32>
    %c0_13 = arith.constant 0 : index
    %c0_14 = arith.constant 0 : index
    %22 = vector.load %arg3[%c0_13, %c0_14] : memref<2x8xf32, #tpu.memory_space<vmem>>, vector<2x8xf32>
    tpu.vector_store %arg3[%c0_13, %c0_14], %21 {strides = array<i32>} : memref<2x8xf32, #tpu.memory_space<vmem>>, vector<2x8xf32>,
    return
  }
  func.func @transform_0(%arg0: i32) -> (i32, i32, i32, i32) {
    %c0_i32 = arith.constant 0 : i32
    %c0_i32_0 = arith.constant 0 : i32
    %c0_i32_1 = arith.constant 0 : i32
    %c0_i32_2 = arith.constant 0 : i32
    return %c0_i32, %c0_i32_0, %arg0, %c0_i32_1 : i32, i32, i32, i32
  }
  func.func @transform_1(%arg0: i32) -> (i32, i32) {
    %c0_i32 = arith.constant 0 : i32
    %c0_i32_0 = arith.constant 0 : i32
    %c0_i32_1 = arith.constant 0 : i32
    return %c0_i32, %c0_i32_0 : i32, i32
  }
  func.func @transform_2(%arg0: i32) -> (i32, i32) {
    %c0_i32 = arith.constant 0 : i32
    %c0_i32_0 = arith.constant 0 : i32
    return %arg0, %c0_i32 : i32, i32
  }
}

</mosaic_0001>

<bundles_post_ra>
// kernel: forward.1
= control target key start
LH: loop header
LB: loop body
LE: loop exit
PB: predicated region body
PF: predicated region fallthrough
CT: control target
= control target key end

     0   :  { %7 = vsyncpa [#allocation3], 0  ;;  %s524_s0 = inlined_call_operand.hbm [shape: f32[2,2,2,8], index: 0, kind: input, shape index: {}]   ;;  %s525_s1 = inlined_call_operand.hbm [shape: f32[160,128], index: 1, kind: input, shape index: {}]   ;;  %s526_s2 = inlined_call_operand.hbm [shape: f32[2,8], index: 2, kind: output, shape index: {}]  }
   0x1   :  { %8 = vsyncpa [#allocation6], 0 }
   0x2   :  { %9 = vsyncpa [#allocation4], 0  ;;  %s460_s9 = smov [#allocation2]  }
   0x3   :  { %s15_s10 = sshll.u32 %s460_s9, 4  ;;  %s16_s10 = int_to_ptr.vmem [resolvable:$true] %s15_s10 }
   0x4   :  { %s402_s11 = scalar_lea.vmem %s16_s10, 128  ;;  %p407_p1 = scmp.lt.s32.totalorder %s16_s10, %s16_s10 }
   0x5   :  { %p403_p0 = scmp.ne.s32.totalorder %s16_s10, %s402_s11  ;;  %p408_p2 = scmp.lt.s32.totalorder %s402_s11, %s402_s11 }
   0x7   :  { %p409_p3 = por %p408_p2, %p407_p1 }
   0x9   :  { %p410_p4 = pnand %p409_p3, %p403_p0 }
   0xb   :  { %413 = shalt.err (!%p410_p4)
}
   0xc   :  { %s461_s12 = smov 32   ;;  %s462_s13 = smov 2  }
   0xd   :  { %21 = dma.hbm_to_vmem [thread:$0]  %s524_s0, 128, %s16_s10, [#allocation3], %s461_s12, %s461_s12, %s462_s13  }
   0xe   :  { %s463_s16 = smov [#allocation5]  }
   0xf   :  { %s27_s17 = sshll.u32 %s463_s16, 4  ;;  %s28_s17 = int_to_ptr.vmem [resolvable:$true] %s27_s17 }
  0x10   :  { %s422_s18 = scalar_lea.vmem %s28_s17, 2560  ;;  %p427_p6 = scmp.lt.s32.totalorder %s28_s17, %s28_s17 }
  0x11   :  { %p423_p5 = scmp.ne.s32.totalorder %s28_s17, %s422_s18  ;;  %p428_p7 = scmp.lt.s32.totalorder %s422_s18, %s422_s18 }
  0x13   :  { %p429_p8 = por %p428_p7, %p427_p6 }
  0x15   :  { %p430_p9 = pnand %p429_p8, %p423_p5 }
  0x17   :  { %433 = shalt.err (!%p430_p9)
}
  0x18   :  { %s464_s19 = smov 128   ;;  %s465_s20 = smov 8  }
  0x19   :  { %33 = dma.hbm_to_vmem [thread:$0]  %s525_s1, 2560, %s28_s17, [#allocation6], %s464_s19, %s464_s19, %s465_s20  }
  0x1a   :  { %454 = dma.done.wait [#allocation3], 128  }
  0x1b   :  { %455 = vsyncadd [#allocation3], 4294967168 }
  0x1c   :  { %456 = dma.done.wait [#allocation6], 2560  }
  0x1d   :  { %457 = vsyncadd [#allocation6], 4294964736  ;;  %v466_v0 = vmov 0.0   ;;  %vm467_vm0 = vmmov 0   ;;  %vm44_vm1 = vcmask 58368   ;;  %v52_v1 = vld [vmem:[#allocation5 + $0x8] sm:$0xff] }
  0x1e   :  { %340 = vmatprep.subr.mxu1 %v466_v0  ;;  %342 = vmatprep.mubr.msk.f32.mxu1 %vm467_vm0, %v466_v0  ;;  %v41_v2 = vld [vmem:[#allocation2 + $0x2] sm:$0x3]  ;;  %v43_v3 = vld [vmem:[#allocation2 + $0x6] sm:$0x3]  ;;  %vm53_vm2 = vcmask 64512   ;;  %v216_v7 = vld [vmem:[#allocation5 + $0x90] sm:$0xff] }
  0x1f   :  { %350 = vmatprep.subr.mxu0 %v466_v0  ;;  %382 = vmatprep.mubr.msk.f32.mxu0 %vm467_vm0, %v466_v0  ;;  %v48_v4 = vsel %vm44_vm1, %v41_v2, 0.0  ;;  %v49_v5 = vsel %vm44_vm1, %v43_v3, 0.0  ;;  %v40_v6 = vld [vmem:[#allocation2] sm:$0x3]  ;;  %v51_v9 = vld [vmem:[#allocation5] sm:$0xff]  ;;  %v215_v12 = vld [vmem:[#allocation5 + $0x88] sm:$0xff] }
  0x20   :  { %341 = vmatpush3.msra.mxu1 %v52_v1  ;;  %v50_v8 = vadd.f32 %v49_v5, %v48_v4  ;;  %v42_v10 = vld [vmem:[#allocation2 + $0x4] sm:$0x3]  ;;  %v45_v11 = vsel %vm44_vm1, %v40_v6, 0.0  ;;  %351 = vmatpush3.msra.mxu0 %v216_v7  ;;  %v214_v15 = vld [vmem:[#allocation5 + $0x80] sm:$0xff]  ;;  %v212_v17 = vld [vmem:[#allocation5 + $0x70] sm:$0xff]  ;;  %s468_s0 = smov [#allocation7]  }
  0x21   :  { %345 = vmatprep.subr.mxu1 %v466_v0  ;;  %v46_v13 = vsel %vm44_vm1, %v42_v10, 0.0  ;;  %352 = vmatprep.subr.mxu0 %v466_v0  ;;  %v213_v16 = vld [vmem:[#allocation5 + $0x78] sm:$0xff]  ;;  %v211_v18 = vld [vmem:[#allocation5 + $0x68] sm:$0xff]  ;;  %v210_v19 = vld [vmem:[#allocation5 + $0x60] sm:$0xff]  ;;  %s305_s1 = sshll.u32 %s468_s0, 4  ;;  %s306_s1 = int_to_ptr.vmem [resolvable:$true] %s305_s1 }
  0x22   :  { %343 = vmatmul.mubr.msk.f32.vlgmr.msra.gmra.mxu1 %vm53_vm2, %v50_v8  ;;  %v47_v14 = vadd.f32 %v46_v13, %v45_v11  ;;  %353 = vmatpush3.msra.mxu0 %v215_v12  ;;  %v209_v20 = vld [vmem:[#allocation5 + $0x58] sm:$0xff]  ;;  %v208_v21 = vld [vmem:[#allocation5 + $0x50] sm:$0xff]  ;;  %v207_v22 = vld [vmem:[#allocation5 + $0x48] sm:$0xff]  ;;  %s434_s23 = scalar_lea.vmem %s306_s1, 32  ;;  %p439_p11 = scmp.lt.s32.totalorder %s306_s1, %s306_s1 }
  0x23   :  { %346 = vmatpush3.msra.mxu1 %v51_v9  ;;  %347 = vmatprep.mubr.msk.f32.mxu1 %vm467_vm0, %v466_v0  ;;  %v206_v23 = vld [vmem:[#allocation5 + $0x40] sm:$0xff]  ;;  %v205_v24 = vld [vmem:[#allocation5 + $0x38] sm:$0xff]  ;;  %v204_v25 = vld [vmem:[#allocation5 + $0x30] sm:$0xff]  ;;  %p435_p10 = scmp.ne.s32.totalorder %s306_s1, %s434_s23  ;;  %p440_p12 = scmp.lt.s32.totalorder %s434_s23, %s434_s23 }
  0x24   :  { %354 = vmatprep.subr.mxu0 %v466_v0  ;;  %v203_v26 = vld [vmem:[#allocation5 + $0x28] sm:$0xff]  ;;  %v202_v27 = vld [vmem:[#allocation5 + $0x20] sm:$0xff]  ;;  %v201_v28 = vld [vmem:[#allocation5 + $0x18] sm:$0xff] }
  0x25   :  { %355 = vmatpush3.msra.mxu0 %v214_v15  ;;  %v317_v32 = vld [vmem:[#allocation5 + $0x10] ss:$0 sm:$0xff]  ;;  %v318_v37 = vld [vmem:[#allocation5 + $0x98] ss:$0 sm:$0xff]  ;;  %p441_p13 = por %p440_p12, %p439_p11 }
  0x26   :  { %348 = vmatmul.mubr.msk.f32.vlgmr.msra.gmra.mxu1 %vm53_vm2, %v47_v14  ;;  %356 = vmatprep.subr.mxu0 %v466_v0 }
  0x27   :  { %357 = vmatpush3.msra.mxu0 %v213_v16  ;;  %p442_p0 = pnand %p441_p13, %p435_p10 }
  0x28   :  { %358 = vmatprep.subr.mxu0 %v466_v0 }
  0x29   :  { %359 = vmatpush3.msra.mxu0 %v212_v17 }
  0x2a   :  { %360 = vmatprep.subr.mxu0 %v466_v0 }
  0x2b   :  { %361 = vmatpush3.msra.mxu0 %v211_v18 }
  0x2c   :  { %362 = vmatprep.subr.mxu0 %v466_v0 }
  0x2d   :  { %363 = vmatpush3.msra.mxu0 %v210_v19 }
  0x2e   :  { %364 = vmatprep.subr.mxu0 %v466_v0 }
  0x2f   :  { %365 = vmatpush3.msra.mxu0 %v209_v20 }
  0x30   :  { %366 = vmatprep.subr.mxu0 %v466_v0 }
  0x31   :  { %367 = vmatpush3.msra.mxu0 %v208_v21 }
  0x32   :  { %368 = vmatprep.subr.mxu0 %v466_v0 }
  0x33   :  { %369 = vmatpush3.msra.mxu0 %v207_v22 }
  0x34   :  { %370 = vmatprep.subr.mxu0 %v466_v0 }
  0x35   :  { %371 = vmatpush3.msra.mxu0 %v206_v23 }
  0x36   :  { %372 = vmatprep.subr.mxu0 %v466_v0 }
  0x37   :  { %373 = vmatpush3.msra.mxu0 %v205_v24 }
  0x38   :  { %374 = vmatprep.subr.mxu0 %v466_v0 }
  0x39   :  { %375 = vmatpush3.msra.mxu0 %v204_v25 }
  0x3a   :  { %376 = vmatprep.subr.mxu0 %v466_v0 }
  0x3b   :  { %377 = vmatpush3.msra.mxu0 %v203_v26 }
  0x3c   :  { %378 = vmatprep.subr.mxu0 %v466_v0 }
  0x3d   :  { %379 = vmatpush3.msra.mxu0 %v202_v27 }
  0x3e   :  { %380 = vmatprep.subr.mxu0 %v466_v0 }
  0x3f   :  { %381 = vmatpush3.msra.mxu0 %v201_v28 }
  0xe2   :  { %v123_v29 = vpop.f32.mrf.mxu1 }
  0xe4   :  { %v344_v30 = vpop.f32.mrf.mxu1 }
  0xe6   :  { %v196_v31 = vpop.f32.mrf.mxu1 }
  0xe7   :  { %v197_v33 = vadd.f32 %v196_v31, %v123_v29 }
  0xe8   :  { %v349_v34 = vpop.f32.mrf.mxu1 }
  0xe9   :  { %v222_v35 = vadd.f32 %v317_v32, %v197_v33 }
  0xeb   :  { %v223_v36 = vmax.f32 %v222_v35, 0.0 }
  0xed   :  { %383 = vmatmul.mubr.f32.vlgmr.msra.gmra.mxu0 %v223_v36 }
 0x1ad   :  { %v294_v38 = vpop.f32.mrf.mxu0 }
 0x1ae   :  { %v295_v39 = vadd.f32 %v318_v37, %v294_v38 }
 0x1af   :  { %v384_v40 = vpop.f32.mrf.mxu0 }
 0x1b0   :  { %298 = vst.msk [vmem:[#allocation7] sm:$0x3] %vm44_vm1, %v295_v39 }
 0x1b1   :  { %445 = shalt.err (!%p442_p0)
}
 0x1b2   :  { %308 = dma.vmem_to_hbm [thread:$0]  %s306_s1, 32, %s526_s2, [#allocation4]  }
 0x1b3   :  { %458 = dma.done.wait [#allocation4], 32  }
 0x1b4   :  { %459 = vsyncadd [#allocation4], 4294967264 }
 0x1b5   :  { %312 = vsyncpa [#allocation3], 1 }
 0x1b6   :  { %313 = vsyncpa [#allocation6], 1 }
 0x1b7   :  { %314 = vsyncpa [#allocation4], 1 }

</bundles_post_ra>
